<compile_context>
chip_gen: v6e
topology: v6e:2x2x1
jax: 0.10.0
libtpu: 0.0.40
codegen_flags: <defaults>
</compile_context>

<pallas_src>
import functools

import jax
import jax.numpy as jnp
from jax import lax
from jax.experimental import pallas as pl
from jax.experimental.pallas import tpu as pltpu


def _scale_norm_kernel(g_ref, x_ref, o_ref, *, inv_scale, inv_eps):
    """out = x / max(||x||_2 * dim**-0.5, eps) * g   (row-wise, last dim).

    Implemented as  out = x * min(rsqrt(sum(x^2)) * dim**0.5, 1/eps) * g,
    which is algebraically identical and handles sum(x^2) == 0 correctly
    (rsqrt(0)=inf -> clamped to 1/eps, and x == 0 there anyway).
    """
    # Row reduction from a cast-on-read (no full-tile f32 temp kept live).
    xf = x_ref[...].astype(jnp.float32)
    sq = jnp.sum(xf * xf, axis=-1, keepdims=True)              # (tile_rows, 1)
    inv = jnp.minimum(lax.rsqrt(sq) * inv_scale, inv_eps)      # 1 / clamp(norm, eps)
    inv = inv * g_ref[0].astype(jnp.float32)                   # fold in the gain
    # Second VMEM read of x for the scaling pass; vld bandwidth (3/cycle)
    # makes it free and avoids the extra f32 live range on bf16/fp8 inputs.
    o_ref[...] = (x_ref[...].astype(jnp.float32) * inv).astype(o_ref.dtype)


def _tpu_vmem_capacity_bytes():
    try:
        return int(pltpu.get_tpu_info().vmem_capacity_bytes)
    except Exception:
        return 64 * 1024 * 1024   # tightest generation (v7x) as safe fallback


def _tpu_num_tensorcores():
    try:
        info = pltpu.get_tpu_info()
    except Exception:
        return 1
    for name in ("num_cores", "num_tensorcores", "tensorcores_per_chip",
                 "cores_per_chip"):
        v = getattr(info, name, None)
        if isinstance(v, int) and v > 0:
            return v
    return 1


def _pick_tiling(rows, dim, itemsize, num_cores):
    """Row-tile size + scoped-VMEM limit, generation- and dtype-aware."""
    # Sublane packing multiple: 8 rows (f32), 16 (bf16/f16), 32 (int8/fp8).
    packing = max(8, 32 // max(1, itemsize))

    vmem_cap = _tpu_vmem_capacity_bytes()
    # Scoped-VMEM limit: ~60% of physical capacity (never above 96 MiB).
    vmem_limit = min(int(vmem_cap * 0.6), 96 * 1024 * 1024)

    # Per-row VMEM cost: 2x double-buffered input + 2x double-buffered output
    # tiles in the native dtype, plus an f32 working-set allowance for the
    # in-kernel upcast (budgeted even though the kernel avoids keeping it
    # live, in case the compiler CSEs the two reads).
    bytes_per_row = dim * (4 * itemsize + 4)
    budget = int(vmem_limit * 0.75)
    max_tile_rows = (budget // max(1, bytes_per_row)) // packing * packing
    max_tile_rows = max(packing, max_tile_rows)

    rows_rounded = -(-rows // packing) * packing
    tile_rows = min(max_tile_rows, rows_rounded)

    # Multi-TC chips (v7x): make sure there are >= num_cores row blocks so
    # CORE_PARALLEL can shard them.  Single-TC chips (v5e/v6e): keep one
    # maximal tile; an extra grid step is a serial loop, pure overhead.
    if num_cores > 1:
        per_core = -(-rows_rounded // num_cores)
        per_core = -(-per_core // packing) * packing
        tile_rows = max(packing, min(tile_rows, per_core))

    # Very large `dim`: even a minimum-height tile can exceed the budget —
    # raise the limit to cover it (clamped to physical VMEM).
    required = tile_rows * dim * (4 * itemsize + 4) + (2 << 20)
    if required > vmem_limit:
        vmem_limit = min(vmem_cap, required)
        # TODO(synk): add last-dim blocking (two-pass sum of squares over dim
        # chunks) for dims too large for even a `packing`-row tile.

    return tile_rows, vmem_limit


def scale_norm(x, g, *, eps=1e-4):
    """ScaleNorm forward. x: (..., dim), g: shape (1,) learnable gain."""
    orig_shape = x.shape
    orig_dtype = x.dtype
    dim = orig_shape[-1]

    # Flatten leading dims into rows (lane axis = dim = reduction axis).
    rows = 1
    for s in orig_shape[:-1]:
        rows *= s
    x2 = x.reshape(rows, dim)

    itemsize = jnp.dtype(orig_dtype).itemsize
    num_cores = _tpu_num_tensorcores()
    tile_rows, vmem_limit = _pick_tiling(rows, dim, itemsize, num_cores)
    grid = (pl.cdiv(rows, tile_rows),)      # ragged last block handled by Pallas

    if num_cores > 1 and grid[0] >= num_cores:
        dim_semantics = (pltpu.CORE_PARALLEL,)   # shard row blocks across TCs
    else:
        dim_semantics = (pltpu.ARBITRARY,)

    kernel = functools.partial(
        _scale_norm_kernel,
        inv_scale=float(dim) ** 0.5,
        inv_eps=1.0 / float(eps),
    )

    out = pl.pallas_call(
        kernel,
        out_shape=jax.ShapeDtypeStruct((rows, dim), orig_dtype),
        grid_spec=pltpu.PrefetchScalarGridSpec(
            num_scalar_prefetch=0,
            grid=grid,
            in_specs=[
                pl.BlockSpec(memory_space=pltpu.SMEM),             # g: (1,) scalar
                pl.BlockSpec((tile_rows, dim), lambda i: (i, 0)),  # x row tile
            ],
            out_specs=pl.BlockSpec((tile_rows, dim), lambda i: (i, 0)),
        ),
        compiler_params=pltpu.CompilerParams(
            dimension_semantics=dim_semantics,
            vmem_limit_bytes=int(vmem_limit),
        ),
    )(g, x2)

    return out.reshape(orig_shape)


def scale_norm_ref(x, g, *, eps=1e-4):
    """Pure-JAX reference mirroring the PyTorch module."""
    dim = x.shape[-1]
    scale = dim ** (-0.5)
    norm = jnp.linalg.norm(x.astype(jnp.float32), axis=-1, keepdims=True) * scale
    norm = jnp.maximum(norm, eps)
    return (x.astype(jnp.float32) / norm * g[0]).astype(x.dtype)


if __name__ == "__main__":
    key = jax.random.PRNGKey(0)

    # Deterministic parameter init: nn.Parameter(torch.ones(1))
    g = jnp.ones((1,), dtype=jnp.float32)

    # Main small test (module-implied shapes: batch=2, seq=8, hidden=32).
    batch, seq, hidden = 2, 8, 32
    x = jax.random.normal(key, (batch, seq, hidden), dtype=jnp.float32)
    out = jax.block_until_ready(scale_norm(x, g, eps=1e-4))
    ref = scale_norm_ref(x, g, eps=1e-4)
    assert out.shape == x.shape, (out.shape, x.shape)
    assert jnp.allclose(out, ref, atol=1e-5, rtol=1e-4), "f32 mismatch vs reference"

    # Ragged rows (3*5 = 15): padded block rows are computed but never
    # written back, so results still match.
    x2 = jax.random.normal(jax.random.PRNGKey(1), (3, 5, hidden), dtype=jnp.float32)
    out2 = jax.block_until_ready(scale_norm(x2, g, eps=1e-4))
    ref2 = scale_norm_ref(x2, g, eps=1e-4)
    assert out2.shape == x2.shape, (out2.shape, x2.shape)
    assert jnp.allclose(out2, ref2, atol=1e-5, rtol=1e-4), "ragged mismatch vs reference"

    # bf16 with a lane-dense last dim (multiple of 128); rows=48 exercises
    # the 16-row sublane packing for 2-byte dtypes.
    x3 = jax.random.normal(jax.random.PRNGKey(2), (4, 12, 128), dtype=jnp.bfloat16)
    out3 = jax.block_until_ready(scale_norm(x3, g, eps=1e-4))
    ref3 = scale_norm_ref(x3, g, eps=1e-4)
    assert out3.shape == x3.shape, (out3.shape, x3.shape)
    assert jnp.allclose(out3.astype(jnp.float32), ref3.astype(jnp.float32),
                        atol=2e-2, rtol=2e-2), "bf16 mismatch vs reference"

    print("KERNEL_OK")
</pallas_src>

<mosaic_0001>
module attributes {stable_mosaic.version = 11 : i64} {
  func.func @_scale_norm_kernel(%arg0: i32, %arg1: memref<1xf32, #tpu.memory_space<smem>>, %arg2: memref<16x32xf32, #tpu.memory_space<vmem>>, %arg3: memref<16x32xf32, #tpu.memory_space<vmem>>) attributes {dimension_semantics = [#tpu.dimension_semantics<arbitrary>], iteration_bounds = array<i64: 1>, scalar_prefetch = 0 : i64, scratch_operands = 0 : i64, tpu.core_type = #tpu.core_type<tc>, window_params = [{transform_indices = @transform_0, window_bounds = array<i64: 1>}, {transform_indices = @transform_1, window_bounds = array<i64: 16, 32>}, {transform_indices = @transform_2, window_bounds = array<i64: 16, 32>}]} {
    %c0 = arith.constant 0 : index
    %c0_0 = arith.constant 0 : index
    %0 = vector.load %arg2[%c0, %c0_0] : memref<16x32xf32, #tpu.memory_space<vmem>>, vector<16x32xf32>
    %1 = arith.mulf %0, %0 : vector<16x32xf32>
    %cst = arith.constant dense<0.000000e+00> : vector<16xf32>
    %2 = vector.multi_reduction <add>, %1, %cst [1] : vector<16x32xf32> to vector<16xf32>
    %3 = vector.shape_cast %2 : vector<16xf32> to vector<16x1xf32>
    %4 = math.rsqrt %3 : vector<16x1xf32>
    %cst_1 = arith.constant 5.65685415 : f32
    %5 = vector.broadcast %cst_1 : f32 to vector<16x1xf32>
    %6 = arith.mulf %4, %5 : vector<16x1xf32>
    %cst_2 = arith.constant 1.000000e+04 : f32
    %7 = vector.broadcast %cst_2 : f32 to vector<16x1xf32>
    %8 = arith.minimumf %6, %7 : vector<16x1xf32>
    %c0_3 = arith.constant 0 : index
    %9 = memref.load %arg1[%c0_3] : memref<1xf32, #tpu.memory_space<smem>>
    %10 = vector.broadcast %9 : f32 to vector<16x1xf32>
    %11 = arith.mulf %8, %10 : vector<16x1xf32>
    %c0_4 = arith.constant 0 : index
    %c0_5 = arith.constant 0 : index
    %12 = vector.load %arg2[%c0_4, %c0_5] : memref<16x32xf32, #tpu.memory_space<vmem>>, vector<16x32xf32>
    %13 = vector.broadcast %11 : vector<16x1xf32> to vector<16x32xf32>
    %14 = arith.mulf %12, %13 : vector<16x32xf32>
    %c0_6 = arith.constant 0 : index
    %c0_7 = arith.constant 0 : index
    %15 = vector.load %arg3[%c0_6, %c0_7] : memref<16x32xf32, #tpu.memory_space<vmem>>, vector<16x32xf32>
    tpu.vector_store %arg3[%c0_6, %c0_7], %14 {strides = array<i32>} : memref<16x32xf32, #tpu.memory_space<vmem>>, vector<16x32xf32>,
    return
  }
  func.func @transform_0(%arg0: i32) -> i32 {
    %c0_i32 = arith.constant 0 : i32
    %c0_i32_0 = arith.constant 0 : i32
    return %c0_i32 : i32
  }
  func.func @transform_1(%arg0: i32) -> (i32, i32) {
    %c0_i32 = arith.constant 0 : i32
    %c0_i32_0 = arith.constant 0 : i32
    return %arg0, %c0_i32 : i32, i32
  }
  func.func @transform_2(%arg0: i32) -> (i32, i32) {
    %c0_i32 = arith.constant 0 : i32
    %c0_i32_0 = arith.constant 0 : i32
    return %arg0, %c0_i32 : i32, i32
  }
}

</mosaic_0001>

<bundles_post_ra>
// kernel: tpu_custom_call.1
= control target key start
LH: loop header
LB: loop body
LE: loop exit
PB: predicated region body
PF: predicated region fallthrough
CT: control target
= control target key end

     0   :  { %8 = vsyncpa [#allocation4], 0  ;;  %s159_s0 = inlined_call_operand.<no memory space> [shape: f32[1], index: 0, kind: input, shape index: {}]   ;;  %s160_s1 = inlined_call_operand.hbm [shape: f32[16,32], index: 1, kind: input, shape index: {}]   ;;  %s161_s2 = inlined_call_operand.hbm [shape: f32[16,32], index: 2, kind: output, shape index: {}]  }
   0x1   :  { %9 = vsyncpa [#allocation5], 0  ;;  %s121_s9 = smov [#allocation3]  }
   0x2   :  { %s17_s10 = sshll.u32 %s121_s9, 4  ;;  %s18_s10 = int_to_ptr.vmem [resolvable:$true] %s17_s10 }
   0x3   :  { %s85_s11 = scalar_lea.vmem %s18_s10, 256  ;;  %p90_p1 = scmp.lt.s32.totalorder %s18_s10, %s18_s10 }
   0x4   :  { %p86_p0 = scmp.ne.s32.totalorder %s18_s10, %s85_s11  ;;  %p91_p2 = scmp.lt.s32.totalorder %s85_s11, %s85_s11 }
   0x6   :  { %p92_p3 = por %p91_p2, %p90_p1 }
   0x8   :  { %p93_p4 = pnand %p92_p3, %p86_p0 }
   0xa   :  { %96 = shalt.err (!%p93_p4)
}
   0xb   :  { %s122_s12 = smov 128   ;;  %s123_s13 = smov 8  }
   0xc   :  { %23 = dma.hbm_to_vmem [thread:$0]  %s160_s1, 256, %s18_s10, [#allocation4], %s122_s12, %s122_s12, %s123_s13  }
   0xd   :  { %117 = dma.done.wait [#allocation4], 256  }
   0xe   :  { %118 = vsyncadd [#allocation4], 4294967040  ;;  %v27_v0 = vld [vmem:[#allocation3] sm:$0xff]  ;;  %vm31_vm0 = vcmask 261120   ;;  %v28_v1 = vld [vmem:[#allocation3 + $0x8] sm:$0xff]  ;;  %v45_v10 = vstv %s159_s0  ;;  %s124_s17 = smov [#allocation6]  }
   0xf   :  { %v29_v2 = vmul.f32 %v27_v0, %v27_v0  ;;  %v30_v3 = vmul.f32 %v28_v1, %v28_v1  ;;  %s57_s18 = sshll.u32 %s124_s17, 4  ;;  %s58_s18 = int_to_ptr.vmem [resolvable:$true] %s57_s18 }
  0x10   :  { %s97_s19 = scalar_lea.vmem %s58_s18, 256  ;;  %p102_p6 = scmp.lt.s32.totalorder %s58_s18, %s58_s18 }
  0x11   :  { %v32_v4 = vsel %vm31_vm0, %v29_v2, 0.0  ;;  %v35_v5 = vsel %vm31_vm0, %v30_v3, 0.0  ;;  %p98_p5 = scmp.ne.s32.totalorder %s58_s18, %s97_s19  ;;  %p103_p7 = scmp.lt.s32.totalorder %s97_s19, %s97_s19 }
  0x12   :  { %33 = vadd.xlane.f32.xlu0 %v32_v4 }
  0x13   :  { %p104_p8 = por %p103_p7, %p102_p6 }
  0x15   :  { %p105_p9 = pnand %p104_p8, %p98_p5 }
  0x16   :  { %36 = vadd.xlane.f32.xlu0 %v35_v5 }
  0x9b   :  { %v34_v6 = vpop.xlane.xlu0 %33 }
  0x9c   :  { %73 = vrsqrt.f32 %v34_v6 }
  0x9f   :  { %v37_v7 = vpop.xlane.xlu0 %36 }
  0xa0   :  { %75 = vrsqrt.f32 %v37_v7 }
  0xa9   :  { %v74_v8 = vpop.eup %73 }
  0xaa   :  { %v40_v9 = vmul.f32 5.656854, %v74_v8 }
  0xac   :  { %v42_v11 = vmin.f32 %v40_v9, 10000.0 }
  0xad   :  { %v76_v12 = vpop.eup %75 }
  0xae   :  { %v46_v13 = vmul.f32 %v45_v10, %v42_v11  ;;  %v41_v14 = vmul.f32 5.656854, %v76_v12 }
  0xb0   :  { %v43_v15 = vmin.f32 %v41_v14, 10000.0  ;;  %v48_v16 = vmul.f32 %v46_v13, %v27_v0 }
  0xb2   :  { %v47_v17 = vmul.f32 %v45_v10, %v43_v15  ;;  %50 = vst.msk [vmem:[#allocation6] sm:$0xff] %vm31_vm0, %v48_v16 }
  0xb4   :  { %v49_v18 = vmul.f32 %v47_v17, %v28_v1 }
  0xb6   :  { %51 = vst.msk [vmem:[#allocation6 + $0x8] sm:$0xff] %vm31_vm0, %v49_v18 }
  0xb7   :  { %108 = shalt.err (!%p105_p9)
}
  0xb8   :  { %63 = dma.vmem_to_hbm [thread:$0]  %s58_s18, 256, %s161_s2, [#allocation5], %s122_s12, %s122_s12, %s123_s13  }
  0xb9   :  { %119 = dma.done.wait [#allocation5], 256  }
  0xba   :  { %120 = vsyncadd [#allocation5], 4294967040 }
  0xbb   :  { %67 = vsyncpa [#allocation4], 1 }
  0xbc   :  { %68 = vsyncpa [#allocation5], 1 }

</bundles_post_ra>
